<compile_context>
chip_gen: v6e
topology: v6e:2x2x1
jax: 0.10.0
libtpu: 0.0.40
codegen_flags: <defaults>
</compile_context>

<pallas_src>
import functools

import jax
import jax.numpy as jnp
from jax.experimental import pallas as pl
from jax.experimental.pallas import tpu as pltpu


def _conv_bn_act_kernel(w_ref, x_ref, shift_ref, o_ref, *scratch,
                        apply_act, n_k, w_resident, compute_dtype):
    # w_ref:     resident: (n_k, Cout, tile_cin) | streamed: (Cout, tile_cin)  (compute dtype)
    # x_ref:     (1, tile_cin, tile_hw)  native input dtype (cast here, per tile)
    # shift_ref: (Cout, 1) f32  (beta - running_mean * scale)
    # o_ref:     (1, Cout, tile_hw)  out dtype; k-invariant block -> VMEM resident
    # scratch:   optional (Cout, tile_hw) f32 acc (only when out dtype != f32 and n_k > 1)
    k = pl.program_id(2)

    if w_resident:
        w_blk = w_ref[k] if n_k > 1 else w_ref[0]
    else:
        w_blk = w_ref[...]

    part = jnp.dot(w_blk, x_ref[0].astype(compute_dtype),
                   preferred_element_type=jnp.float32)

    def _finalize(acc_f32):
        y = acc_f32 + shift_ref[...]          # broadcast over lanes
        if apply_act:
            y = jnp.maximum(y, 0.0)
        return y.astype(o_ref.dtype)

    if n_k == 1:
        o_ref[0] = _finalize(part)
    elif not scratch:
        # f32 output: accumulate directly into the resident output block.
        @pl.when(k == 0)
        def _():
            o_ref[0] = part

        @pl.when((k > 0) & (k < n_k - 1))
        def _():
            o_ref[0] += part

        @pl.when(k == n_k - 1)
        def _():
            o_ref[0] = _finalize(o_ref[0] + part)
    else:
        acc_ref = scratch[0]

        @pl.when(k == 0)
        def _():
            acc_ref[...] = part

        @pl.when((k > 0) & (k < n_k - 1))
        def _():
            acc_ref[...] += part

        @pl.when(k == n_k - 1)
        def _():
            o_ref[0] = _finalize(acc_ref[...] + part)


def _vmem_capacity_bytes():
    try:
        cap = getattr(pltpu.get_tpu_info(), "vmem_capacity_bytes", None)
        if cap:
            return int(cap)
    except Exception:
        pass
    return 64 * 1024 * 1024  # conservative fallback (v7x per-TensorCore VMEM)


def conv_bn_act(x_nchw, conv_w, gamma, beta, running_mean, running_var, *,
                eps=1e-5, apply_act=True, compute_dtype=jnp.bfloat16,
                out_dtype=jnp.float32, max_hw_tile=4096):
    """Forward of ConvBnAct with kernel_size=1, stride=1, padding=0, groups=1,
    bias=False, BatchNorm2d in eval mode (running statistics).

    x_nchw : (N, Cin, H, W)
    conv_w : (Cout, Cin, 1, 1) (PyTorch Conv2d weight layout)
    returns: (N, Cout, H, W) in `out_dtype` (default f32).
    """
    N, Cin, H, W = x_nchw.shape
    Cout = conv_w.shape[0]
    HW = H * W

    # ---- Fold BN (eval mode) into the conv weight; only a shift remains. ----
    scale = gamma / jnp.sqrt(running_var + eps)                       # (Cout,)
    w = (conv_w.reshape(Cout, Cin) * scale[:, None]).astype(compute_dtype)
    shift = (beta - running_mean * scale).reshape(Cout, 1).astype(jnp.float32)

    # Keep NCHW: pure reshape, no transpose, no wrapper-side dtype cast.
    x = x_nchw.reshape(N, Cin, HW)

    # ---- K (Cin) tiling: only split when it divides evenly (no ragged K). ----
    if Cin <= 512:
        tile_cin = Cin
    elif Cin % 512 == 0:
        tile_cin = 512
    elif Cin % 256 == 0:
        tile_cin = 256
    elif Cin % 128 == 0:
        tile_cin = 128
    else:
        tile_cin = Cin
    n_k = Cin // tile_cin

    # ---- Per-generation VMEM plan (v5e/v6e 128 MiB, v7x 64 MiB). ----
    vmem_cap = _vmem_capacity_bytes()
    plan_budget = (vmem_cap * 5) // 8        # ~40 MiB on 64 MiB chips, ~80 MiB on 128 MiB
    vmem_limit = int(min((vmem_cap * 3) // 4, plan_budget + (16 << 20)))

    itemsize_c = jnp.dtype(compute_dtype).itemsize
    in_itemsize = jnp.dtype(x_nchw.dtype).itemsize
    out_itemsize = jnp.dtype(out_dtype).itemsize

    # Keep the whole folded weight VMEM-resident (constant block index => DMA'd
    # exactly once) when it comfortably fits.
    w_db_bytes = 2 * Cout * Cin * itemsize_c            # double-buffer-safe estimate
    w_resident = w_db_bytes <= plan_budget // 3
    use_acc_scratch = (n_k > 1) and (jnp.dtype(out_dtype) != jnp.dtype(jnp.float32))

    # ---- Spatial (lane) tile sized against the plan budget. ----
    fixed = (w_db_bytes if w_resident else 2 * Cout * tile_cin * itemsize_c)
    fixed += 2 * Cout * 4 + (2 << 20)                   # shift blocks + internal scratch headroom
    avail = max(plan_budget - fixed, 4 << 20)
    bytes_per_col = (2 * tile_cin * in_itemsize         # x double-buffer (native dtype)
                     + 2 * Cout * out_itemsize          # out double-buffer
                     + (4 * Cout if use_acc_scratch else 0))
    cap = max(256, (avail // bytes_per_col) // 128 * 128)
    max_tile = min(max_hw_tile, cap)

    if HW <= max_tile:
        tile_hw = HW                      # full dim -> always a legal block
    else:
        # Prefer an exact divisor, but never shrink below max(512, max_tile//2);
        # a single ragged (padded) tail block is cheaper than tiny tiles.
        tile_hw = max_tile
        lo = max(512, max_tile // 2)
        for cand in range(max_tile, lo - 1, -128):
            if HW % cand == 0:
                tile_hw = cand
                break
    n_hw = pl.cdiv(HW, tile_hw)

    # Give 2-TensorCore chips (v7x) at least two "parallel" grid steps.
    if N == 1 and n_hw == 1 and HW >= 256:
        half = -(-HW // 2)
        half = -(-half // 128) * 128
        if half < HW:
            tile_hw = half
            n_hw = pl.cdiv(HW, tile_hw)

    grid = (N, n_hw, n_k)                 # reduction axis (Cin) last

    if w_resident:
        if n_k > 1:
            w_arg = w.reshape(Cout, n_k, tile_cin).transpose(1, 0, 2)
        else:
            w_arg = w.reshape(1, Cout, Cin)
        w_spec = pl.BlockSpec((n_k, Cout, tile_cin), lambda n, i, k: (0, 0, 0))
    else:
        w_arg = w
        w_spec = pl.BlockSpec((Cout, tile_cin), lambda n, i, k: (0, k))

    scratch_shapes = ([pltpu.VMEM((Cout, tile_hw), jnp.float32)]
                      if use_acc_scratch else [])

    kernel = functools.partial(_conv_bn_act_kernel, apply_act=apply_act,
                               n_k=n_k, w_resident=w_resident,
                               compute_dtype=compute_dtype)

    out = pl.pallas_call(
        kernel,
        out_shape=jax.ShapeDtypeStruct((N, Cout, HW), out_dtype),
        grid_spec=pltpu.PrefetchScalarGridSpec(
            num_scalar_prefetch=0,
            grid=grid,
            in_specs=[
                w_spec,
                pl.BlockSpec((1, tile_cin, tile_hw), lambda n, i, k: (n, k, i)),
                pl.BlockSpec((Cout, 1), lambda n, i, k: (0, 0)),
            ],
            out_specs=pl.BlockSpec((1, Cout, tile_hw),
                                   lambda n, i, k: (n, 0, i)),
            scratch_shapes=scratch_shapes,
        ),
        compiler_params=pltpu.CompilerParams(
            dimension_semantics=("parallel", "parallel", "arbitrary"),
            vmem_limit_bytes=vmem_limit),
    )(w_arg, x, shift)

    # (N, Cout, HW) -> (N, Cout, H, W): a pure reshape, no transpose needed.
    return out.reshape(N, Cout, H, W)


if __name__ == "__main__":
    key = jax.random.PRNGKey(0)
    k_x, k_w, k_g, k_b, k_m, k_v = jax.random.split(key, 6)

    N, Cin, H, W = 2, 4, 16, 16
    Cout = 8

    x = jax.random.normal(k_x, (N, Cin, H, W), dtype=jnp.float32)
    conv_w = jax.random.normal(k_w, (Cout, Cin, 1, 1), dtype=jnp.float32) * 0.1
    gamma = 1.0 + 0.1 * jax.random.normal(k_g, (Cout,), dtype=jnp.float32)
    beta = 0.1 * jax.random.normal(k_b, (Cout,), dtype=jnp.float32)
    running_mean = 0.1 * jax.random.normal(k_m, (Cout,), dtype=jnp.float32)
    running_var = jnp.abs(1.0 + 0.1 * jax.random.normal(k_v, (Cout,), dtype=jnp.float32))

    out = conv_bn_act(x, conv_w, gamma, beta, running_mean, running_var,
                      eps=1e-5, apply_act=True)
    out = jax.block_until_ready(out)

    # Pure-JAX f32 reference (1x1 conv == einsum over channels).
    y_ref = jnp.einsum("nchw,oc->nohw", x, conv_w.reshape(Cout, Cin))
    s = gamma / jnp.sqrt(running_var + 1e-5)
    y_ref = y_ref * s[None, :, None, None] + (beta - running_mean * s)[None, :, None, None]
    y_ref = jnp.maximum(y_ref, 0.0)

    assert out.shape == (N, Cout, H, W)
    # bf16 matmul operands (f32 accumulation) -> loosened tolerance vs f32 ref.
    assert jnp.allclose(out, y_ref, atol=2e-2, rtol=2e-2), \
        float(jnp.max(jnp.abs(out - y_ref)))

    print("KERNEL_OK")
</pallas_src>

<mosaic_0001>
module attributes {stable_mosaic.version = 11 : i64} {
  func.func @_conv_bn_act_kernel(%arg0: i32, %arg1: i32, %arg2: i32, %arg3: memref<1x8x4xbf16, #tpu.memory_space<vmem>>, %arg4: memref<1x4x256xf32, #tpu.memory_space<vmem>>, %arg5: memref<8x1xf32, #tpu.memory_space<vmem>>, %arg6: memref<1x8x256xf32, #tpu.memory_space<vmem>>) attributes {dimension_semantics = [#tpu.dimension_semantics<parallel>, #tpu.dimension_semantics<parallel>, #tpu.dimension_semantics<arbitrary>], iteration_bounds = array<i64: 2, 1, 1>, scalar_prefetch = 0 : i64, scratch_operands = 0 : i64, tpu.core_type = #tpu.core_type<tc>, window_params = [{pipeline_mode = #tpu.pipeline_mode<synchronous>, transform_indices = @transform_0, window_bounds = array<i64: 1, 8, 4>}, {transform_indices = @transform_1, window_bounds = array<i64: 1, 4, 256>}, {pipeline_mode = #tpu.pipeline_mode<synchronous>, transform_indices = @transform_2, window_bounds = array<i64: 8, 1>}, {transform_indices = @transform_3, window_bounds = array<i64: 1, 8, 256>}]} {
    %c0 = arith.constant 0 : index
    %c0_0 = arith.constant 0 : index
    %c0_1 = arith.constant 0 : index
    %0 = vector.load %arg3[%c0, %c0_0, %c0_1] : memref<1x8x4xbf16, #tpu.memory_space<vmem>>, vector<1x8x4xbf16>
    %1 = vector.shape_cast %0 : vector<1x8x4xbf16> to vector<8x4xbf16>
    %c0_2 = arith.constant 0 : index
    %c0_3 = arith.constant 0 : index
    %c0_4 = arith.constant 0 : index
    %2 = vector.load %arg4[%c0_2, %c0_3, %c0_4] : memref<1x4x256xf32, #tpu.memory_space<vmem>>, vector<1x4x256xf32>
    %3 = vector.shape_cast %2 : vector<1x4x256xf32> to vector<4x256xf32>
    %4 = arith.truncf %3 : vector<4x256xf32> to vector<4x256xbf16>
    %cst = arith.constant dense<0.000000e+00> : vector<8x256xf32>
    %5 = tpu.matmul %1, %4, %cst {dimension_numbers = #tpu.dot_dimension_numbers<[1], [0], [0], [1], [0, 0, 1, 1], [], []>} : vector<8x4xbf16>, vector<4x256xbf16>, vector<8x256xf32> -> vector<8x256xf32>
    %c0_5 = arith.constant 0 : index
    %c0_6 = arith.constant 0 : index
    %6 = vector.load %arg5[%c0_5, %c0_6] : memref<8x1xf32, #tpu.memory_space<vmem>>, vector<8x1xf32>
    %7 = vector.broadcast %6 : vector<8x1xf32> to vector<8x256xf32>
    %8 = arith.addf %5, %7 : vector<8x256xf32>
    %cst_7 = arith.constant 0.000000e+00 : f32
    %9 = vector.broadcast %cst_7 : f32 to vector<8x256xf32>
    %10 = arith.maximumf %8, %9 : vector<8x256xf32>
    %c0_8 = arith.constant 0 : index
    %c0_9 = arith.constant 0 : index
    %c0_10 = arith.constant 0 : index
    %11 = vector.load %arg6[%c0_8, %c0_9, %c0_10] : memref<1x8x256xf32, #tpu.memory_space<vmem>>, vector<1x8x256xf32>
    %12 = vector.shape_cast %11 : vector<1x8x256xf32> to vector<8x256xf32>
    %13 = vector.shape_cast %10 : vector<8x256xf32> to vector<1x8x256xf32>
    tpu.vector_store %arg6[%c0_8, %c0_9, %c0_10], %13 {strides = array<i32>} : memref<1x8x256xf32, #tpu.memory_space<vmem>>, vector<1x8x256xf32>,
    return
  }
  func.func @transform_0(%arg0: i32, %arg1: i32, %arg2: i32) -> (i32, i32, i32) {
    %c0_i32 = arith.constant 0 : i32
    %c0_i32_0 = arith.constant 0 : i32
    %c0_i32_1 = arith.constant 0 : i32
    %c0_i32_2 = arith.constant 0 : i32
    return %c0_i32, %c0_i32_0, %c0_i32_1 : i32, i32, i32
  }
  func.func @transform_1(%arg0: i32, %arg1: i32, %arg2: i32) -> (i32, i32, i32) {
    %c0_i32 = arith.constant 0 : i32
    return %arg0, %arg2, %arg1 : i32, i32, i32
  }
  func.func @transform_2(%arg0: i32, %arg1: i32, %arg2: i32) -> (i32, i32) {
    %c0_i32 = arith.constant 0 : i32
    %c0_i32_0 = arith.constant 0 : i32
    %c0_i32_1 = arith.constant 0 : i32
    return %c0_i32, %c0_i32_0 : i32, i32
  }
  func.func @transform_3(%arg0: i32, %arg1: i32, %arg2: i32) -> (i32, i32, i32) {
    %c0_i32 = arith.constant 0 : i32
    %c0_i32_0 = arith.constant 0 : i32
    return %arg0, %c0_i32, %arg1 : i32, i32, i32
  }
}

</mosaic_0001>

<bundles_post_ra>
// kernel: tpu_custom_call.1
= control target key start
LH: loop header
LB: loop body
LE: loop exit
PB: predicated region body
PF: predicated region fallthrough
CT: control target
= control target key end

     0   :  { %8 = vsyncpa [#allocation3], 0  ;;  %s679_s0 = inlined_call_operand.vmem [shape: bf16[1,8,4], index: 0, kind: input, shape index: {}]   ;;  %s680_s1 = inlined_call_operand.vmem [shape: f32[2,4,256], index: 1, kind: input, shape index: {}]   ;;  %s681_s2 = inlined_call_operand.vmem [shape: f32[8,1], index: 2, kind: input, shape index: {}]   ;;  %s682_s3 = inlined_call_operand.hbm [shape: f32[2,8,256], index: 3, kind: output, shape index: {}]  }
   0x1   :  { %10 = vsyncpa [#allocation3 + $0x1], 0  ;;  %s568_s12 = smov 0   ;;  %s570_s13 = smov 0  }
   0x2   :  { %s572_s14 = smov 0   ;;  %s574_s15 = smov 0  }
   0x3   :  { %s576_s16 = smov 0   ;;  %s578_s17 = smov 0  }
   0x4 LB: > { %s393_s18 = sadd.s32 4294967295, %s544_s17   ;;  %s394_s19 = sadd.s32 4294967294, %s544_s17   ;;  %s544_s17 = sphi %s578_s17, %s16_s17   ;;  %s540_s16 = sphi %s576_s16, %s689_s16   ;;  %s536_s15 = sphi %s574_s15, %s688_s15   ;;  %s532_s14 = sphi %s572_s14, %s687_s14   ;;  %s528_s13 = sphi %s570_s13, %s686_s13   ;;  %s524_s12 = sphi %s568_s12, %s685_s12  }
   0x5   : > { %s35_s20 = sadd.s32 1, %s540_s16  ;;  %s116_s21 = sadd.s32 1, %s532_s14 }
   0x6   : > { %p37_p0 = scmp.ge.s32.totalorder %s35_s20, 2  ;;  %p126_p1 = scmp.ne.s32.totalorder %s532_s14, %s528_s13 }
   0x7   : > { %p127_p2 = scmp.eq.s32.totalorder %s393_s18, 1  ;;  %p132_p3 = scmp.ne.s32.totalorder %s528_s13, %s524_s12 }
   0x8   : > { %s691_s20 = smov (%p37_p0, %s35_s20), 0  ;;  %p133_p5 = scmp.eq.s32.totalorder %s394_s19, 1 }
   0x9   : > { %p608_p4 = por %p127_p2, %p126_p1  ;;  %s111_s23 = ssub.s32 %s540_s16, %s691_s20 }
   0xa   : > { %p397_p6 = scmp.ge.s32.totalorder %s544_s17, 1  ;;  %p114_p7 = scmp.eq.s32.totalorder %s111_s23, 0 }
   0xb   : > { %p615_p8 = por %p133_p5, %p132_p3  ;;  %p174_p9 = scmp.lt.s32.totalorder %s544_s17, 3 }
   0xc   : > { %s621_s25 = scalar_select %p114_p7, %s532_s14, %s116_s21  }
   0xd   : > { %p175_p10 = pnand %p397_p6, %p174_p9 }
   0xe   : > { %p207_p11 = scmp.lt.s32.totalorder (!%p175_p10), %s536_s15, 1  ;;  %s203_s8 = sand.u32 (!%p175_p10), 1, %s528_s13  }
   0xf   : > { %178 = sbr.rel (%p175_p10) target bundleno = 245 (0xf5), region = 32  ;;  %s398_s9 = sshll.u32 (!%p175_p10), %s203_s8, 4 }
  0x10   : > { %s409_s10 = sshll.u32 (!%p175_p10), %s536_s15, 8  ;;  %s205_s11 = scalar_lea.vmem (!%p175_p10), [#allocation2], %s398_s9 }
  0x11   : > { %s308_s18 = sshll.u32 (!%p175_p10), %s205_s11, 4  ;;  %s639_s23 = scalar_lea.hbm (!%p175_p10), %s682_s3, %s409_s10  ;;  %s309_s18 = int_to_ptr.vmem [resolvable:$true] %s308_s18 }
  0x12   : > { %s292_s26 = scalar_lea.sflag (!%p175_p10), [#allocation3], %s203_s8  ;;  %s468_s27 = scalar_lea.vmem (!%p175_p10), %s309_s18, 256 }
  0x13   : > { %p469_p12 = scmp.ne.s32.totalorder (!%p175_p10), %s309_s18, %s468_s27 }
  0x14   : > { %v546_v0 = vmov 0   ;;  %v229_v1 = vld [vmem:[%s681_s2] sm:$0xff]  ;;  %s208_s28 = scalar_select %p207_p11, %s536_s15, 1  ;;  %vm239_vm0 = vcmask 1041408   ;;  %vm235_vm1 = vcmask 31744  }
  0x15   : > { %278 = vmatprep.mubr.bf16.mxu0 %v546_v0  ;;  %466 = vset.pattern.permute.xlu0 %v546_v0  ;;  %v222_v7 = vld [vmem:[%s679_s0] sm:$0xf]  ;;  %p470_p13 = pnand %p469_p12, %p608_p4  ;;  %s547_s15 = smov [#allocation2]  }
  0x16   : > { %232 = vperm.xlu0 %466, %v229_v1   ;;  %s408_s29 = sshll.u32 %s208_s28, 3  ;;  %s472_s28 = sshll.u32 %s547_s15, 4  ;;  %s473_s28 = int_to_ptr.vmem [resolvable:$false] %s472_s28 }
  0x17   : > { %s218_s5 = scalar_lea.vmem %s680_s1, %s408_s29  ;;  %p471_p0 = pneg %p470_p13 }
  0x18   : > { %v223_v2 = vld [vmem:[%s218_s5] sm:$0xff]  ;;  %s474_s29 = scalar_lea.vmem %s473_s28, 512  ;;  %p475_p1 = scmp.lt.s32.totalorder %s309_s18, %s473_s28 }
  0x19   : > { %v225_v3 = vcombine.high %v223_v2, %v223_v2  ;;  %v227_v4 = vpack.c.bf16 %v223_v2, %v223_v2  ;;  %p476_p2 = scmp.lt.s32.totalorder %s474_s29, %s468_s27 }
  0x1b   : > { %v228_v5 = vpack.c.bf16 %v225_v3, %v225_v3  ;;  %v241_v6 = vsel %vm239_vm0, %v227_v4, 0  ;;  %p477_p3 = por %p476_p2, %p475_p1 }
  0x1d   : > { %401 = vmatprep.subr.msk.bf16.mxu0 %vm239_vm0, %v228_v5  ;;  %p478_p5 = pnand %p477_p3, %p471_p0 }
  0x1e   : > { %261 = vmatpush1.bf16.msra.mxu0 %v241_v6 }
  0x21   : > { %402 = vmatmul.mubr.msk.bf16.vlgmr.msra.gmra.mxu0 %vm235_vm1, %v222_v7 }
  0x91   : > { %v233_v8 = vpop.permute.xlu0 %232 }
  0xe1   : > { %v280_v9 = vpop.f32.mrf.mxu0 }
  0xe2   : > { %v281_v10 = vadd.f32 %v280_v9, %v233_v8 }
  0xe3   : > { %v282_v11 = vpop.f32.mrf.mxu0 }
  0xe4   : > { %v287_v12 = vmax.f32 %v281_v10, 0.0  ;;  %v283_v13 = vadd.f32 %v282_v11, %v233_v8 }
  0xe5   : > { %v284_v14 = vpop.f32.mrf.mxu0 }
  0xe6   : > { %289 = vst [vmem:[%s205_s11] sm:$0xff] %v287_v12  ;;  %v288_v15 = vmax.f32 %v283_v13, 0.0 }
  0xe7   : > { %v285_v16 = vpop.f32.mrf.mxu0 }
  0xe8   : > { %290 = vst [vmem:[%s205_s11 + $0x8] sm:$0xff] %v288_v15 }
  0xe9   : > { %481 = shalt.err (!%p478_p5)
}
  0xea   : > { %s482_s30 = scalar_lea.hbm %s639_s23, 256  ;;  %s486_s6 = scalar_lea.hbm %s682_s3, 512 }
  0xeb   : > { %p483_p6 = scmp.ne.s32.totalorder %s639_s23, %s482_s30  ;;  %p487_p10 = scmp.lt.s32.totalorder %s639_s23, %s682_s3 }
  0xec   : > { %p488_p11 = scmp.lt.s32.totalorder %s486_s6, %s482_s30 }
  0xed   : > { %p484_p7 = pnand %p483_p6, %p608_p4 }
  0xee   : > { %p489_p12 = por %p488_p11, %p487_p10 }
  0xef   : > { %p485_p9 = pneg %p484_p7 }
  0xf1   : > { %p490_p13 = pnand %p489_p12, %p485_p9 }
  0xf3   : > { %493 = shalt.err (!%p490_p13)
}
  0xf4   : > { %410 = dma.vmem_to_hbm [thread:$0]  (%p608_p4), %s309_s18, 256, %s639_s23, %s292_s26  }
  0xf5 PF: > { %p416_p0 = scmp.ge.s32.totalorder %s544_s17, 2  ;;  %s320_s9 = sand.u32 1, %s524_s12  }
  0xf6   : > { %s321_s10 = scalar_lea.sflag [#allocation3], %s320_s9 }
  0xf7   : > { %p413_p1 = pnand %p416_p0, %p615_p8 }
  0xf9   : > { %p414_p2 = pneg %p413_p1 }
  0xfb   : > { %519 = dma.done.wait (%p414_p2), %s321_s10, 256  }
  0xfc   : > { %521 = vsyncadd (%p414_p2), %s321_s10, 4294967040  ;;  %s16_s17 = sadd.s32 1, %s544_s17   ;;  %s685_s12 = smov %s528_s13 }
  0xfd   : > { %p13_p3 = scmp.ge.s32.totalorder %s16_s17, 4   ;;  %s686_s13 = smov %s532_s14 }
  0xfe   : > { %s687_s14 = smov %s621_s25  ;;  %s688_s15 = smov %s540_s16 }
  0xff   : > { %s689_s16 = smov %s691_s20  ;;  %15 = sbr.rel (!%p13_p3) target bundleno = 4 (0x4), region = 67 }
 0x104   :  { %326 = vsyncpa [#allocation3], 1 }
 0x105   :  { %328 = vsyncpa [#allocation3 + $0x1], 1 }

</bundles_post_ra>
